<compile_context>
chip_gen: v6e
topology: v6e:2x2x1
jax: 0.10.0
libtpu: 0.0.40
codegen_flags: <defaults>
</compile_context>

<pallas_src>
import functools

import jax
import jax.numpy as jnp
from jax import lax
from jax.experimental import pallas as pl
from jax.experimental.pallas import tpu as pltpu


class CombinatorError(Exception):
    pass


class NumericalStabilityError(CombinatorError):
    pass


class ValidationError(CombinatorError):
    pass


_LANE = 128
_SUBLANE = 8
_NUM_COMPONENTS = 3
_NUM_STATS = 4             # [sum d^2, sum |d|, sum relu(|d|-1)^2, max |d|]
_MAX_BLOCK_ROWS = 8192     # 4 MiB f32 per input block per grid step
_CHUNK_ROWS = 512          # inner compute chunk: bounds VMEM for intermediates
_NUM_CORES = 2             # leading "parallel" grid axis (v7x: 2 TensorCores)
# 2 inputs x 2 pipeline buffers x 4 MiB = 16 MiB of input buffering plus ~2 MiB
# of chunk intermediates; 48 MiB leaves headroom and stays under v7x's 64 MiB
# physical VMEM while overriding v5e's 16 MiB default scoped limit.
_VMEM_LIMIT_BYTES = 48 * 1024 * 1024


def _round_up(x, m):
    return ((x + m - 1) // m) * m


def _combinator_kernel(pred_ref, tgt_ref, out_ref, *,
                       rows, block_rows, chunk_rows, inner_steps, nblocks):
    """One grid step over a (block_rows, 128) tile.

    Accumulates [sum d^2, sum |d|, sum relu(|d|-1)^2, max |d|] into the
    resident (4, 8, 128) f32 output block for this core; the cross-lane
    reduction and the SmoothL1 reconstruction happen in the wrapper.
    """
    c = pl.program_id(0)       # core-split axis ("parallel")
    i = pl.program_id(1)       # streaming step within this core ("arbitrary")

    @pl.when(i == 0)
    def _init():
        out_ref[...] = jnp.zeros_like(out_ref)

    n_chunks = block_rows // chunk_rows
    groups = chunk_rows // _SUBLANE
    # The masked path is only traced when a partial / duplicated block can
    # actually occur (trace-time constants).
    has_ragged = (rows % block_rows != 0) or (_NUM_CORES * inner_steps != nblocks)

    def fold_sum(x):
        return jnp.sum(x.reshape(groups, _SUBLANE, _LANE), axis=0)

    def fold_max(x):
        return jnp.max(x.reshape(groups, _SUBLANE, _LANE), axis=0)

    def accumulate(diff):
        absd = jnp.abs(diff)
        mse = diff * diff
        # Huber identity: SmoothL1(beta=1) = 0.5*d^2 - 0.5*relu(|d|-1)^2.
        # (Reconstruction in the wrapper; precision loss is ~|d|*eps relative,
        # negligible below the 1e6 "large value" warning threshold.)
        exc = jnp.maximum(absd - 1.0, 0.0)
        out_ref[0] = out_ref[0] + fold_sum(mse)
        out_ref[1] = out_ref[1] + fold_sum(absd)
        out_ref[2] = out_ref[2] + fold_sum(exc * exc)
        out_ref[3] = jnp.maximum(out_ref[3], fold_max(absd))

    def process_chunk(ci, start):
        p = pred_ref[pl.ds(start, chunk_rows), :].astype(jnp.float32)
        t = tgt_ref[pl.ds(start, chunk_rows), :].astype(jnp.float32)
        diff = p - t
        if not has_ragged:
            accumulate(diff)
        else:
            gb = c * inner_steps + i                      # global block index
            rows_remaining = rows - (gb * block_rows + ci * chunk_rows)

            @pl.when(rows_remaining >= chunk_rows)        # full chunk: no mask
            def _full():
                accumulate(diff)

            @pl.when(rows_remaining < chunk_rows)         # partial / OOB chunk
            def _partial():
                # Mask must hit diff before any derived quantity.
                row_ids = lax.broadcasted_iota(
                    jnp.int32, (chunk_rows, _LANE), 0)
                accumulate(jnp.where(row_ids < rows_remaining, diff, 0.0))

    if n_chunks == 1:
        process_chunk(0, 0)
    else:
        @pl.loop(0, n_chunks)
        def _(ci):
            process_chunk(ci, pl.multiple_of(ci * chunk_rows, chunk_rows))


def _run_pallas(pred2d, tgt2d):
    """Stream pred/target once; return per-core partial stats (2, 4, 8, 128)."""
    rows = pred2d.shape[0]
    itemsize = jnp.dtype(pred2d.dtype).itemsize
    # Sub-32-bit dtypes pack along sublanes: keep the row block aligned to the
    # packed tile (8 rows f32, 16 bf16/f16, 32 int8) to avoid relayouts.
    row_align = _SUBLANE * max(1, 4 // itemsize)

    if rows <= _CHUNK_ROWS:
        block_rows = _round_up(rows, row_align)
        chunk_rows = block_rows
    else:
        # Split the work across the 2-core axis, then cap at 4 MiB f32 blocks.
        per_core = pl.cdiv(rows, _NUM_CORES)
        block_rows = min(_MAX_BLOCK_ROWS, _round_up(per_core, _CHUNK_ROWS))
        chunk_rows = _CHUNK_ROWS

    nblocks = pl.cdiv(rows, block_rows)
    inner_steps = pl.cdiv(nblocks, _NUM_CORES)

    kernel = functools.partial(
        _combinator_kernel, rows=rows, block_rows=block_rows,
        chunk_rows=chunk_rows, inner_steps=inner_steps, nblocks=nblocks)

    def in_map(c, i):
        # Clamp duplicated / out-of-range trailing blocks; their contribution
        # is fully masked inside the kernel.
        return (jnp.minimum(c * inner_steps + i, nblocks - 1), 0)

    partials = pl.pallas_call(
        kernel,
        out_shape=jax.ShapeDtypeStruct(
            (_NUM_CORES * _NUM_STATS, _SUBLANE, _LANE), jnp.float32),
        grid_spec=pltpu.PrefetchScalarGridSpec(
            num_scalar_prefetch=0,
            grid=(_NUM_CORES, inner_steps),
            in_specs=[
                pl.BlockSpec((block_rows, _LANE), in_map),
                pl.BlockSpec((block_rows, _LANE), in_map),
            ],
            # Per-core resident accumulator block (constant across the inner
            # "arbitrary" axis, distinct per core on the "parallel" axis).
            out_specs=pl.BlockSpec((_NUM_STATS, _SUBLANE, _LANE),
                                   lambda c, i: (c, 0, 0)),
        ),
        compiler_params=pltpu.CompilerParams(
            dimension_semantics=("parallel", "arbitrary"),
            vmem_limit_bytes=_VMEM_LIMIT_BYTES),
    )(pred2d, tgt2d)
    return partials.reshape(_NUM_CORES, _NUM_STATS, _SUBLANE, _LANE)


@functools.partial(jax.jit, static_argnames=("reduction",))
def _forward(pred, target, weights, *, reduction):
    n = pred.size
    flat_p = pred.reshape(-1)
    flat_t = target.reshape(-1)
    n_main = (n // _LANE) * _LANE
    rows = n_main // _LANE

    if rows > 0:
        # Common case (n % 128 == 0): these reshapes are free bitcasts.
        # TODO(synk): for n % 128 != 0 the prefix slice may still materialize a
        # copy in XLA; a fully copy-free ragged-lane path needs a 1-D
        # manual-DMA kernel variant.
        p2 = (flat_p if n_main == n else flat_p[:n_main]).reshape(rows, _LANE)
        t2 = (flat_t if n_main == n else flat_t[:n_main]).reshape(rows, _LANE)
        partials = _run_pallas(p2, t2)
        sums = jnp.sum(partials[:, :_NUM_COMPONENTS], axis=(0, 2, 3))
        amax = jnp.max(partials[:, _NUM_COMPONENTS])
    else:
        sums = jnp.zeros((_NUM_COMPONENTS,), jnp.float32)
        amax = jnp.float32(0.0)

    if n_main != n:
        # <128-element sliver handled in plain JAX (no full-array padding).
        tp = flat_p[n_main:].astype(jnp.float32)
        tt = flat_t[n_main:].astype(jnp.float32)
        d = tp - tt
        a = jnp.abs(d)
        e = jnp.maximum(a - 1.0, 0.0)
        sums = sums + jnp.stack([jnp.sum(d * d), jnp.sum(a), jnp.sum(e * e)])
        amax = jnp.maximum(amax, jnp.max(a))

    msum, l1sum, excsum = sums[0], sums[1], sums[2]
    sl1sum = 0.5 * (msum - excsum)                       # Huber identity
    comp_sums = jnp.stack([msum, l1sum, sl1sum])

    # Per-component max|.| derived from max|diff|: every component is a
    # non-negative monotone function of |diff|.
    mse_max = amax * amax
    sl1_max = jnp.where(amax < 1.0, 0.5 * mse_max, amax - 0.5)
    comp_maxs = jnp.stack([mse_max, amax, sl1_max])

    # _combine_losses (weighted sum) and the 'mean'/'sum' reduction are linear
    # -> compute directly from the component sums.
    loss = jnp.dot(weights, comp_sums)
    if reduction == "mean":
        loss = loss / jnp.float32(n)

    # _check_numerical_stability flags (stay on device until the wrapper syncs).
    nonfinite = ((~jnp.isfinite(amax)) | jnp.isinf(mse_max)
                 | jnp.any(~jnp.isfinite(comp_sums)))
    warn_large = jnp.max(comp_maxs) > 1.0e6
    return loss, comp_sums, comp_maxs, nonfinite, warn_large


class WeightedSumCombinator:
    """JAX/Pallas port of BaseCombinator with a weighted-sum `_combine_losses`.

    Components are element-wise MSE, L1 and SmoothL1(beta=1), fused into a
    single bandwidth-bound Pallas kernel that streams pred/target exactly once.
    """

    def __init__(self, weights, reduction="mean",
                 validate_inputs=True, numerical_stability_check=True,
                 gradient_clipping=None, stability_check_interval=1):
        if len(weights) != _NUM_COMPONENTS:
            raise ValidationError("Expected one weight per component")
        if reduction not in ("mean", "sum"):
            # TODO(synk): reduction='none' needs the full element-wise combined
            # tensor (a store-heavy variant kernel); not wired up here.
            raise ValueError(f"Unknown reduction: {reduction}")
        self.weights = jnp.asarray(weights, dtype=jnp.float32)
        self.reduction = reduction
        self.validate_inputs = validate_inputs
        self.numerical_stability_check = numerical_stability_check
        self.gradient_clipping = gradient_clipping
        # 1 => original semantics (raise in the same forward, one tiny sync).
        # >1 => flags OR'd on device and synced every K calls (fully async).
        self.stability_check_interval = max(1, int(stability_check_interval))
        self._forward_count = 0
        self._numerical_warnings = 0
        self._last_component_outputs = None
        self._pending_nonfinite = None
        self._pending_warn_large = None

    def __call__(self, pred, target):
        self._forward_count += 1
        if self.validate_inputs:
            if pred.shape != target.shape:
                raise ValidationError(
                    f"Prediction shape {pred.shape} doesn't match target "
                    f"shape {target.shape}")

        loss, comp_sums, comp_maxs, nonfinite, warn_large = _forward(
            pred, target, self.weights, reduction=self.reduction)
        del comp_maxs  # summary only; kept in _forward for debugging hooks

        # Summary statistics only (full per-element component tensors are
        # intentionally never materialized).
        self._last_component_outputs = comp_sums

        if self.numerical_stability_check:
            self._record_stability_flags(nonfinite, warn_large)

        # TODO(synk): gradient_clipping uses a backward hook (register_hook);
        # it has no forward-pass effect, so it is intentionally omitted.
        return loss

    def _record_stability_flags(self, nonfinite, warn_large):
        if self.stability_check_interval == 1:
            # Original semantics: raise inside the offending forward call.
            if bool(warn_large):
                self._numerical_warnings += 1
            if bool(nonfinite):
                raise NumericalStabilityError(
                    "NaN/Inf detected in component outputs")
            return
        # Periodic mode: OR flags on device, sync only every K calls so the
        # dispatch pipeline stays asynchronous.
        if self._pending_nonfinite is None:
            self._pending_nonfinite = nonfinite
            self._pending_warn_large = warn_large
        else:
            self._pending_nonfinite = jnp.logical_or(
                self._pending_nonfinite, nonfinite)
            self._pending_warn_large = jnp.logical_or(
                self._pending_warn_large, warn_large)
        if self._forward_count % self.stability_check_interval == 0:
            self.flush_stability_checks()

    def flush_stability_checks(self):
        """Resolve any pending (device-side) stability flags."""
        if self._pending_nonfinite is None:
            return
        nonfinite = bool(self._pending_nonfinite)
        warn_large = bool(self._pending_warn_large)
        self._pending_nonfinite = None
        self._pending_warn_large = None
        if warn_large:
            # TODO(synk): counts once per checked window, not once per call.
            self._numerical_warnings += 1
        if nonfinite:
            raise NumericalStabilityError(
                "NaN/Inf detected in component outputs")

    def get_component_outputs(self):
        return self._last_component_outputs

    def get_statistics(self):
        return {"forward_count": self._forward_count,
                "numerical_warnings": self._numerical_warnings,
                "num_components": _NUM_COMPONENTS,
                "reduction": self.reduction,
                "gradient_clipping": self.gradient_clipping}

    def reset_statistics(self):
        self._forward_count = 0
        self._numerical_warnings = 0


if __name__ == "__main__":
    key = jax.random.PRNGKey(0)
    kp, kt = jax.random.split(key)
    w = [0.5, 0.3, 0.2]

    def ref_loss(p, t, weights, reduction="mean"):
        p = p.astype(jnp.float32)
        t = t.astype(jnp.float32)
        d = p - t
        a = jnp.abs(d)
        combined = (weights[0] * d * d + weights[1] * a
                    + weights[2] * jnp.where(a < 1.0, 0.5 * d * d, a - 0.5))
        return jnp.mean(combined) if reduction == "mean" else jnp.sum(combined)

    combinator = WeightedSumCombinator(weights=w)

    # Case 1: standard NCHW activations (numel % 128 == 0 -> free reshape).
    pred = jax.random.normal(kp, (2, 4, 16, 16), dtype=jnp.float32)
    target = jax.random.normal(kt, (2, 4, 16, 16), dtype=jnp.float32)
    loss = jax.block_until_ready(combinator(pred, target))
    ref = ref_loss(pred, target, w)
    assert jnp.allclose(loss, ref, rtol=1e-5, atol=1e-6), (loss, ref)

    # Case 2: row count not a multiple of the sublane tile -> exercises the
    # masked (ragged) chunk path inside the kernel.
    pred2 = jax.random.normal(kp, (2, 4, 16, 10), dtype=jnp.float32)
    target2 = jax.random.normal(kt, (2, 4, 16, 10), dtype=jnp.float32)
    loss2 = jax.block_until_ready(combinator(pred2, target2))
    ref2 = ref_loss(pred2, target2, w)
    assert jnp.allclose(loss2, ref2, rtol=1e-5, atol=1e-6), (loss2, ref2)

    # Case 3: numel not a multiple of 128 -> kernel on the 128-aligned prefix
    # plus a plain-JAX sliver (no full-array padding).
    pred3 = jax.random.normal(kp, (2, 3, 5, 7), dtype=jnp.float32)
    target3 = jax.random.normal(kt, (2, 3, 5, 7), dtype=jnp.float32)
    loss3 = jax.block_until_ready(combinator(pred3, target3))
    ref3 = ref_loss(pred3, target3, w)
    assert jnp.allclose(loss3, ref3, rtol=1e-5, atol=1e-6), (loss3, ref3)

    # Case 4: bf16 inputs (kernel upcasts per-chunk to f32) + 'sum' reduction.
    combinator_sum = WeightedSumCombinator(weights=w, reduction="sum")
    pred4 = jax.random.normal(kp, (2, 4, 16, 16), dtype=jnp.bfloat16)
    target4 = jax.random.normal(kt, (2, 4, 16, 16), dtype=jnp.bfloat16)
    loss4 = jax.block_until_ready(combinator_sum(pred4, target4))
    ref4 = ref_loss(pred4, target4, w, reduction="sum")
    assert jnp.allclose(loss4, ref4, rtol=1e-4, atol=1e-4), (loss4, ref4)

    print("KERNEL_OK")
</pallas_src>

<mosaic_0001>
module attributes {stable_mosaic.version = 11 : i64} {
  func.func @_combinator_kernel(%arg0: i32, %arg1: i32, %arg2: memref<16x128xf32, #tpu.memory_space<vmem>>, %arg3: memref<16x128xf32, #tpu.memory_space<vmem>>, %arg4: memref<4x8x128xf32, #tpu.memory_space<vmem>>) attributes {dimension_semantics = [#tpu.dimension_semantics<parallel>, #tpu.dimension_semantics<arbitrary>], iteration_bounds = array<i64: 2, 1>, scalar_prefetch = 0 : i64, scratch_operands = 0 : i64, tpu.core_type = #tpu.core_type<tc>, window_params = [{transform_indices = @transform_0, window_bounds = array<i64: 16, 128>}, {transform_indices = @transform_1, window_bounds = array<i64: 16, 128>}, {transform_indices = @transform_2, window_bounds = array<i64: 4, 8, 128>}]} {
    %c0_i32 = arith.constant 0 : i32
    %0 = arith.cmpi eq, %arg1, %c0_i32 : i32
    %1 = arith.extui %0 : i1 to i32
    %c0_i32_0 = arith.constant 0 : i32
    %2 = arith.cmpi ne, %1, %c0_i32_0 : i32
    scf.if %2 {
      %cst = arith.constant 0.000000e+00 : f32
      %17 = vector.broadcast %cst : f32 to vector<4x8x128xf32>
      %c0_10 = arith.constant 0 : index
      %c0_11 = arith.constant 0 : index
      %c0_12 = arith.constant 0 : index
      %18 = vector.load %arg4[%c0_10, %c0_11, %c0_12] : memref<4x8x128xf32, #tpu.memory_space<vmem>>, vector<4x8x128xf32>
      tpu.vector_store %arg4[%c0_10, %c0_11, %c0_12], %17 {strides = array<i32>} : memref<4x8x128xf32, #tpu.memory_space<vmem>>, vector<4x8x128xf32>,
    } else {
    }
    %c0 = arith.constant 0 : index
    %c0_1 = arith.constant 0 : index
    %3 = vector.load %arg2[%c0, %c0_1] : memref<16x128xf32, #tpu.memory_space<vmem>>, vector<16x128xf32>
    %c0_2 = arith.constant 0 : index
    %c0_3 = arith.constant 0 : index
    %4 = vector.load %arg3[%c0_2, %c0_3] : memref<16x128xf32, #tpu.memory_space<vmem>>, vector<16x128xf32>
    %5 = arith.subf %3, %4 : vector<16x128xf32>
    %c1_i32 = arith.constant 1 : i32
    %6 = arith.muli %arg0, %c1_i32 : i32
    %7 = arith.addi %6, %arg1 : i32
    %c16_i32 = arith.constant 16 : i32
    %8 = arith.muli %7, %c16_i32 : i32
    %c0_i32_4 = arith.constant 0 : i32
    %9 = arith.addi %8, %c0_i32_4 : i32
    %c16_i32_5 = arith.constant 16 : i32
    %10 = arith.subi %c16_i32_5, %9 : i32
    %c16_i32_6 = arith.constant 16 : i32
    %11 = arith.cmpi sge, %10, %c16_i32_6 : i32
    %12 = arith.extui %11 : i1 to i32
    %c0_i32_7 = arith.constant 0 : i32
    %13 = arith.cmpi ne, %12, %c0_i32_7 : i32
    scf.if %13 {
      %17 = math.absf %5 : vector<16x128xf32>
      %18 = arith.mulf %5, %5 : vector<16x128xf32>
      %cst = arith.constant 1.000000e+00 : f32
      %19 = vector.broadcast %cst : f32 to vector<16x128xf32>
      %20 = arith.subf %17, %19 : vector<16x128xf32>
      %cst_10 = arith.constant 0.000000e+00 : f32
      %21 = vector.broadcast %cst_10 : f32 to vector<16x128xf32>
      %22 = arith.maximumf %20, %21 : vector<16x128xf32>
      %c0_11 = arith.constant 0 : index
      %c0_12 = arith.constant 0 : index
      %c0_13 = arith.constant 0 : index
      %23 = vector.load %arg4[%c0_11, %c0_12, %c0_13] : memref<4x8x128xf32, #tpu.memory_space<vmem>>, vector<1x8x128xf32>
      %24 = vector.shape_cast %23 : vector<1x8x128xf32> to vector<8x128xf32>
      %25 = vector.shape_cast %18 : vector<16x128xf32> to vector<2x8x128xf32>
      %cst_14 = arith.constant dense<0.000000e+00> : vector<8x128xf32>
      %26 = vector.multi_reduction <add>, %25, %cst_14 [0] : vector<2x8x128xf32> to vector<8x128xf32>
      %27 = arith.addf %24, %26 : vector<8x128xf32>
      %c0_15 = arith.constant 0 : index
      %c0_16 = arith.constant 0 : index
      %c0_17 = arith.constant 0 : index
      %28 = vector.load %arg4[%c0_15, %c0_16, %c0_17] : memref<4x8x128xf32, #tpu.memory_space<vmem>>, vector<1x8x128xf32>
      %29 = vector.shape_cast %28 : vector<1x8x128xf32> to vector<8x128xf32>
      %30 = vector.shape_cast %27 : vector<8x128xf32> to vector<1x8x128xf32>
      tpu.vector_store %arg4[%c0_15, %c0_16, %c0_17], %30 {strides = array<i32>} : memref<4x8x128xf32, #tpu.memory_space<vmem>>, vector<1x8x128xf32>,
      %c1 = arith.constant 1 : index
      %c0_18 = arith.constant 0 : index
      %c0_19 = arith.constant 0 : index
      %31 = vector.load %arg4[%c1, %c0_18, %c0_19] : memref<4x8x128xf32, #tpu.memory_space<vmem>>, vector<1x8x128xf32>
      %32 = vector.shape_cast %31 : vector<1x8x128xf32> to vector<8x128xf32>
      %33 = vector.shape_cast %17 : vector<16x128xf32> to vector<2x8x128xf32>
      %cst_20 = arith.constant dense<0.000000e+00> : vector<8x128xf32>
      %34 = vector.multi_reduction <add>, %33, %cst_20 [0] : vector<2x8x128xf32> to vector<8x128xf32>
      %35 = arith.addf %32, %34 : vector<8x128xf32>
      %c1_21 = arith.constant 1 : index
      %c0_22 = arith.constant 0 : index
      %c0_23 = arith.constant 0 : index
      %36 = vector.load %arg4[%c1_21, %c0_22, %c0_23] : memref<4x8x128xf32, #tpu.memory_space<vmem>>, vector<1x8x128xf32>
      %37 = vector.shape_cast %36 : vector<1x8x128xf32> to vector<8x128xf32>
      %38 = vector.shape_cast %35 : vector<8x128xf32> to vector<1x8x128xf32>
      tpu.vector_store %arg4[%c1_21, %c0_22, %c0_23], %38 {strides = array<i32>} : memref<4x8x128xf32, #tpu.memory_space<vmem>>, vector<1x8x128xf32>,
      %c2 = arith.constant 2 : index
      %c0_24 = arith.constant 0 : index
      %c0_25 = arith.constant 0 : index
      %39 = vector.load %arg4[%c2, %c0_24, %c0_25] : memref<4x8x128xf32, #tpu.memory_space<vmem>>, vector<1x8x128xf32>
      %40 = vector.shape_cast %39 : vector<1x8x128xf32> to vector<8x128xf32>
      %41 = arith.mulf %22, %22 : vector<16x128xf32>
      %42 = vector.shape_cast %41 : vector<16x128xf32> to vector<2x8x128xf32>
      %cst_26 = arith.constant dense<0.000000e+00> : vector<8x128xf32>
      %43 = vector.multi_reduction <add>, %42, %cst_26 [0] : vector<2x8x128xf32> to vector<8x128xf32>
      %44 = arith.addf %40, %43 : vector<8x128xf32>
      %c2_27 = arith.constant 2 : index
      %c0_28 = arith.constant 0 : index
      %c0_29 = arith.constant 0 : index
      %45 = vector.load %arg4[%c2_27, %c0_28, %c0_29] : memref<4x8x128xf32, #tpu.memory_space<vmem>>, vector<1x8x128xf32>
      %46 = vector.shape_cast %45 : vector<1x8x128xf32> to vector<8x128xf32>
      %47 = vector.shape_cast %44 : vector<8x128xf32> to vector<1x8x128xf32>
      tpu.vector_store %arg4[%c2_27, %c0_28, %c0_29], %47 {strides = array<i32>} : memref<4x8x128xf32, #tpu.memory_space<vmem>>, vector<1x8x128xf32>,
      %c3 = arith.constant 3 : index
      %c0_30 = arith.constant 0 : index
      %c0_31 = arith.constant 0 : index
      %48 = vector.load %arg4[%c3, %c0_30, %c0_31] : memref<4x8x128xf32, #tpu.memory_space<vmem>>, vector<1x8x128xf32>
      %49 = vector.shape_cast %48 : vector<1x8x128xf32> to vector<8x128xf32>
      %50 = vector.shape_cast %17 : vector<16x128xf32> to vector<2x8x128xf32>
      %cst_32 = arith.constant dense<0xFF800000> : vector<8x128xf32>
      %51 = vector.multi_reduction <maximumf>, %50, %cst_32 [0] : vector<2x8x128xf32> to vector<8x128xf32>
      %52 = arith.maximumf %49, %51 : vector<8x128xf32>
      %c3_33 = arith.constant 3 : index
      %c0_34 = arith.constant 0 : index
      %c0_35 = arith.constant 0 : index
      %53 = vector.load %arg4[%c3_33, %c0_34, %c0_35] : memref<4x8x128xf32, #tpu.memory_space<vmem>>, vector<1x8x128xf32>
      %54 = vector.shape_cast %53 : vector<1x8x128xf32> to vector<8x128xf32>
      %55 = vector.shape_cast %52 : vector<8x128xf32> to vector<1x8x128xf32>
      tpu.vector_store %arg4[%c3_33, %c0_34, %c0_35], %55 {strides = array<i32>} : memref<4x8x128xf32, #tpu.memory_space<vmem>>, vector<1x8x128xf32>,
    } else {
    }
    %c16_i32_8 = arith.constant 16 : i32
    %14 = arith.cmpi slt, %10, %c16_i32_8 : i32
    %15 = arith.extui %14 : i1 to i32
    %c0_i32_9 = arith.constant 0 : i32
    %16 = arith.cmpi ne, %15, %c0_i32_9 : i32
    scf.if %16 {
      %17 = tpu.iota {dimensions = array<i32: 0>} : vector<16x128xi32>
      %18 = vector.broadcast %10 : i32 to vector<16x128xi32>
      %19 = arith.cmpi slt, %17, %18 : vector<16x128xi32>
      %cst = arith.constant 0.000000e+00 : f32
      %20 = vector.broadcast %cst : f32 to vector<16x128xf32>
      %21 = arith.select %19, %5, %20 : vector<16x128xi1>, vector<16x128xf32>
      %22 = math.absf %21 : vector<16x128xf32>
      %23 = arith.mulf %21, %21 : vector<16x128xf32>
      %cst_10 = arith.constant 1.000000e+00 : f32
      %24 = vector.broadcast %cst_10 : f32 to vector<16x128xf32>
      %25 = arith.subf %22, %24 : vector<16x128xf32>
      %cst_11 = arith.constant 0.000000e+00 : f32
      %26 = vector.broadcast %cst_11 : f32 to vector<16x128xf32>
      %27 = arith.maximumf %25, %26 : vector<16x128xf32>
      %c0_12 = arith.constant 0 : index
      %c0_13 = arith.constant 0 : index
      %c0_14 = arith.constant 0 : index
      %28 = vector.load %arg4[%c0_12, %c0_13, %c0_14] : memref<4x8x128xf32, #tpu.memory_space<vmem>>, vector<1x8x128xf32>
      %29 = vector.shape_cast %28 : vector<1x8x128xf32> to vector<8x128xf32>
      %30 = vector.shape_cast %23 : vector<16x128xf32> to vector<2x8x128xf32>
      %cst_15 = arith.constant dense<0.000000e+00> : vector<8x128xf32>
      %31 = vector.multi_reduction <add>, %30, %cst_15 [0] : vector<2x8x128xf32> to vector<8x128xf32>
      %32 = arith.addf %29, %31 : vector<8x128xf32>
      %c0_16 = arith.constant 0 : index
      %c0_17 = arith.constant 0 : index
      %c0_18 = arith.constant 0 : index
      %33 = vector.load %arg4[%c0_16, %c0_17, %c0_18] : memref<4x8x128xf32, #tpu.memory_space<vmem>>, vector<1x8x128xf32>
      %34 = vector.shape_cast %33 : vector<1x8x128xf32> to vector<8x128xf32>
      %35 = vector.shape_cast %32 : vector<8x128xf32> to vector<1x8x128xf32>
      tpu.vector_store %arg4[%c0_16, %c0_17, %c0_18], %35 {strides = array<i32>} : memref<4x8x128xf32, #tpu.memory_space<vmem>>, vector<1x8x128xf32>,
      %c1 = arith.constant 1 : index
      %c0_19 = arith.constant 0 : index
      %c0_20 = arith.constant 0 : index
      %36 = vector.load %arg4[%c1, %c0_19, %c0_20] : memref<4x8x128xf32, #tpu.memory_space<vmem>>, vector<1x8x128xf32>
      %37 = vector.shape_cast %36 : vector<1x8x128xf32> to vector<8x128xf32>
      %38 = vector.shape_cast %22 : vector<16x128xf32> to vector<2x8x128xf32>
      %cst_21 = arith.constant dense<0.000000e+00> : vector<8x128xf32>
      %39 = vector.multi_reduction <add>, %38, %cst_21 [0] : vector<2x8x128xf32> to vector<8x128xf32>
      %40 = arith.addf %37, %39 : vector<8x128xf32>
      %c1_22 = arith.constant 1 : index
      %c0_23 = arith.constant 0 : index
      %c0_24 = arith.constant 0 : index
      %41 = vector.load %arg4[%c1_22, %c0_23, %c0_24] : memref<4x8x128xf32, #tpu.memory_space<vmem>>, vector<1x8x128xf32>
      %42 = vector.shape_cast %41 : vector<1x8x128xf32> to vector<8x128xf32>
      %43 = vector.shape_cast %40 : vector<8x128xf32> to vector<1x8x128xf32>
      tpu.vector_store %arg4[%c1_22, %c0_23, %c0_24], %43 {strides = array<i32>} : memref<4x8x128xf32, #tpu.memory_space<vmem>>, vector<1x8x128xf32>,
      %c2 = arith.constant 2 : index
      %c0_25 = arith.constant 0 : index
      %c0_26 = arith.constant 0 : index
      %44 = vector.load %arg4[%c2, %c0_25, %c0_26] : memref<4x8x128xf32, #tpu.memory_space<vmem>>, vector<1x8x128xf32>
      %45 = vector.shape_cast %44 : vector<1x8x128xf32> to vector<8x128xf32>
      %46 = arith.mulf %27, %27 : vector<16x128xf32>
      %47 = vector.shape_cast %46 : vector<16x128xf32> to vector<2x8x128xf32>
      %cst_27 = arith.constant dense<0.000000e+00> : vector<8x128xf32>
      %48 = vector.multi_reduction <add>, %47, %cst_27 [0] : vector<2x8x128xf32> to vector<8x128xf32>
      %49 = arith.addf %45, %48 : vector<8x128xf32>
      %c2_28 = arith.constant 2 : index
      %c0_29 = arith.constant 0 : index
      %c0_30 = arith.constant 0 : index
      %50 = vector.load %arg4[%c2_28, %c0_29, %c0_30] : memref<4x8x128xf32, #tpu.memory_space<vmem>>, vector<1x8x128xf32>
      %51 = vector.shape_cast %50 : vector<1x8x128xf32> to vector<8x128xf32>
      %52 = vector.shape_cast %49 : vector<8x128xf32> to vector<1x8x128xf32>
      tpu.vector_store %arg4[%c2_28, %c0_29, %c0_30], %52 {strides = array<i32>} : memref<4x8x128xf32, #tpu.memory_space<vmem>>, vector<1x8x128xf32>,
      %c3 = arith.constant 3 : index
      %c0_31 = arith.constant 0 : index
      %c0_32 = arith.constant 0 : index
      %53 = vector.load %arg4[%c3, %c0_31, %c0_32] : memref<4x8x128xf32, #tpu.memory_space<vmem>>, vector<1x8x128xf32>
      %54 = vector.shape_cast %53 : vector<1x8x128xf32> to vector<8x128xf32>
      %55 = vector.shape_cast %22 : vector<16x128xf32> to vector<2x8x128xf32>
      %cst_33 = arith.constant dense<0xFF800000> : vector<8x128xf32>
      %56 = vector.multi_reduction <maximumf>, %55, %cst_33 [0] : vector<2x8x128xf32> to vector<8x128xf32>
      %57 = arith.maximumf %54, %56 : vector<8x128xf32>
      %c3_34 = arith.constant 3 : index
      %c0_35 = arith.constant 0 : index
      %c0_36 = arith.constant 0 : index
      %58 = vector.load %arg4[%c3_34, %c0_35, %c0_36] : memref<4x8x128xf32, #tpu.memory_space<vmem>>, vector<1x8x128xf32>
      %59 = vector.shape_cast %58 : vector<1x8x128xf32> to vector<8x128xf32>
      %60 = vector.shape_cast %57 : vector<8x128xf32> to vector<1x8x128xf32>
      tpu.vector_store %arg4[%c3_34, %c0_35, %c0_36], %60 {strides = array<i32>} : memref<4x8x128xf32, #tpu.memory_space<vmem>>, vector<1x8x128xf32>,
    } else {
    }
    return
  }
  func.func @transform_0(%arg0: i32, %arg1: i32) -> (i32, i32) {
    %c1_i32 = arith.constant 1 : i32
    %0 = arith.muli %arg0, %c1_i32 : i32
    %1 = arith.addi %0, %arg1 : i32
    %c0_i32 = arith.constant 0 : i32
    %2 = arith.minsi %1, %c0_i32 : i32
    %c0_i32_0 = arith.constant 0 : i32
    %c0_i32_1 = arith.constant 0 : i32
    return %2, %c0_i32_0 : i32, i32
  }
  func.func @transform_1(%arg0: i32, %arg1: i32) -> (i32, i32) {
    %c1_i32 = arith.constant 1 : i32
    %0 = arith.muli %arg0, %c1_i32 : i32
    %1 = arith.addi %0, %arg1 : i32
    %c0_i32 = arith.constant 0 : i32
    %2 = arith.minsi %1, %c0_i32 : i32
    %c0_i32_0 = arith.constant 0 : i32
    %c0_i32_1 = arith.constant 0 : i32
    return %2, %c0_i32_0 : i32, i32
  }
  func.func @transform_2(%arg0: i32, %arg1: i32) -> (i32, i32, i32) {
    %c0_i32 = arith.constant 0 : i32
    %c0_i32_0 = arith.constant 0 : i32
    %c0_i32_1 = arith.constant 0 : i32
    return %arg0, %c0_i32, %c0_i32_0 : i32, i32, i32
  }
}

</mosaic_0001>

<bundles_post_ra>
// kernel: _forward.1
= control target key start
LH: loop header
LB: loop body
LE: loop exit
PB: predicated region body
PF: predicated region fallthrough
CT: control target
= control target key end

     0   :  { %s488_s9 = smov 0   ;;  %s490_s10 = smov 0   ;;  %s551_s0 = inlined_call_operand.vmem [shape: f32[16,128], index: 0, kind: input, shape index: {}]   ;;  %s552_s1 = inlined_call_operand.vmem [shape: f32[16,128], index: 1, kind: input, shape index: {}]   ;;  %s553_s2 = inlined_call_operand.vmem [shape: f32[8,8,128], index: 2, kind: output, shape index: {}]  }
   0x1   :  { %s492_s11 = smov 0  }
   0x2 LB: > { %s24_s12 = sadd.s32 1, %s466_s10  ;;  %p395_p0 = scmp.ge.s32.totalorder %s470_s11, 1  ;;  %s470_s11 = sphi %s492_s11, %s12_s11   ;;  %s466_s10 = sphi %s490_s10, %s555_s10   ;;  %s462_s9 = sphi %s488_s9, %s554_s9  }
   0x3   : > { %p26_p1 = scmp.ge.s32.totalorder %s24_s12, 2  ;;  %p160_p2 = scmp.lt.s32.totalorder %s470_s11, 3 }
   0x5   : > { %s557_s12 = smov (%p26_p1, %s24_s12), 0  ;;  %p161_p3 = pnand %p395_p0, %p160_p2 }
   0x6   : > { %p194_p4 = scmp.lt.s32.totalorder (!%p161_p3), %s462_s9, 0  ;;  %s400_s13 = sshll.u32 (!%p161_p3), %s462_s9, 2 }
   0x7   : > { %164 = sbr.rel (%p161_p3) target bundleno = 64 (0x40), region = 28  ;;  %p218_p5 = scmp.lt.s32.totalorder (!%p161_p3), %s400_s13, 7 }
   0x8   : > { %s402_s14 = sshll.u32 (!%p161_p3), %s462_s9, 4 }
   0x9   : > { %s506_s16 = ssub.s32 (!%p161_p3), 16, %s402_s14 }
   0xa   : > { %p403_p7 = scmp.lt.s32.totalorder (!%p161_p3), %s506_s16, 16 }
   0xc   : > { %s559_s9 = smov (!%p194_p4, %s462_s9), 0  ;;  %s561_s13 = smov (!%p218_p5, %s400_s13), 7  ;;  %v472_v0 = vmov 0.0  }
   0xd   : > { %s396_s15 = sshll.u32 %s559_s9, 1  ;;  %s401_s17 = sshll.u32 %s561_s13, 3 }
   0xe   : > { %p197_p6 = scmp.lt.s32.totalorder %s396_s15, 1  ;;  %s511_s20 = scalar_lea.vmem %s553_s2, %s401_s17 }
   0xf   : > { %227 = vst [vmem:[%s511_s20] sm:$0xff] %v472_v0  ;;  %228 = vst [vmem:[%s511_s20 + $0x8] sm:$0xff] %v472_v0 }
  0x10   : > { %s563_s15 = smov (!%p197_p6, %s396_s15), 1  ;;  %229 = vst [vmem:[%s511_s20 + $0x10] sm:$0xff] %v472_v0  ;;  %230 = vst [vmem:[%s511_s20 + $0x18] sm:$0xff] %v472_v0 }
  0x11   : > { %s397_s21 = sshll.u32 %s563_s15, 3  ;;  %243 = sbr.rel (%p403_p7) target bundleno = 36 (0x24), region = 36 }
  0x12   : > { %s200_s24 = scalar_lea.vmem %s551_s0, %s397_s21  ;;  %s212_s27 = scalar_lea.vmem %s552_s1, %s397_s21 }
  0x13   : > { %v231_v1 = vld [vmem:[%s200_s24] sm:$0xff]  ;;  %v232_v2 = vld [vmem:[%s200_s24 + $0x8] sm:$0xff] }
  0x14   : > { %v233_v3 = vld [vmem:[%s212_s27] sm:$0xff]  ;;  %v234_v4 = vld [vmem:[%s212_s27 + $0x8] sm:$0xff] }
  0x15   : > { %v235_v5 = vsub.f32 %v231_v1, %v233_v3  ;;  %v236_v6 = vsub.f32 %v232_v2, %v234_v4 }
  0x16   : > { %v252_v9 = vld [vmem:[%s511_s20] sm:$0xff]  ;;  %v406_v19 = vld [vmem:[%s511_s20 + $0x8] sm:$0xff] }
  0x17   : > { %v246_v7 = vmul.f32 %v235_v5, %v235_v5  ;;  %v247_v8 = vmul.f32 %v236_v6, %v236_v6  ;;  %v244_v12 = vand.u32 2147483647, %v235_v5  ;;  %v245_v13 = vand.u32 2147483647, %v236_v6  ;;  %v408_v24 = vld [vmem:[%s511_s20 + $0x10] sm:$0xff]  ;;  %v410_v27 = vld [vmem:[%s511_s20 + $0x18] sm:$0xff] }
  0x19   : > { %v253_v10 = vadd.f32 %v247_v8, %v246_v7  ;;  %v404_v14 = vadd.f32 -1.0, %v244_v12  ;;  %v405_v15 = vadd.f32 -1.0, %v245_v13  ;;  %v258_v16 = vadd.f32 %v245_v13, %v244_v12 }
  0x1a   : > { %v270_v26 = vmax.f32 %v244_v12, %v245_v13 }
  0x1b   : > { %v254_v11 = vadd.f32 %v253_v10, %v252_v9  ;;  %v250_v17 = vmax.f32 %v404_v14, 0.0  ;;  %v251_v18 = vmax.f32 %v405_v15, 0.0  ;;  %v259_v20 = vadd.f32 %v406_v19, %v258_v16 }
  0x1c   : > { %v271_v28 = vmax.f32 %v410_v27, %v270_v26 }
  0x1d   : > { %255 = vst [vmem:[%s511_s20] sm:$0xff] %v254_v11  ;;  %407 = vst [vmem:[%s511_s20 + $0x8] sm:$0xff] %v259_v20  ;;  %v263_v21 = vmul.f32 %v250_v17, %v250_v17  ;;  %v264_v22 = vmul.f32 %v251_v18, %v251_v18 }
  0x1e   : > { %411 = vst [vmem:[%s511_s20 + $0x18] sm:$0xff] %v271_v28 }
  0x1f   : > { %v265_v23 = vadd.f32 %v264_v22, %v263_v21 }
  0x21   : > { %v266_v25 = vadd.f32 %v408_v24, %v265_v23 }
  0x23   : > { %409 = vst [vmem:[%s511_s20 + $0x10] sm:$0xff] %v266_v25 }
  0x24 PF: > { %p412_p8 = scmp.ge.s32.totalorder %s506_s16, 16 }
  0x26   : > { %276 = sbr.rel (%p412_p8) target bundleno = 64 (0x40), region = 40 }
  0x2b   : > { %v277_v29 = vlaneseq  ;;  %v280_v30 = vstv %s506_s16  ;;  %v293_v37 = vld [vmem:[%s511_s20] sm:$0xff]  ;;  %v415_v47 = vld [vmem:[%s511_s20 + $0x8] sm:$0xff]  ;;  %v417_v52 = vld [vmem:[%s511_s20 + $0x10] sm:$0xff] }
  0x2c   : > { %v419_v55 = vld [vmem:[%s511_s20 + $0x18] sm:$0xff] }
  0x2d   : > { %v278_v31 = vshrl.u32 %v277_v29, 7 }
  0x2f   : > { %v279_v32 = vadd.s32 8, %v278_v31  ;;  %vm281_vm0 = vcmp.lt.s32.totalorder %v278_v31, %v280_v30 }
  0x30   : > { %v283_v33 = vsel %vm281_vm0, %v235_v5, 0.0 }
  0x31   : > { %vm282_vm1 = vcmp.lt.s32.totalorder %v279_v32, %v280_v30  ;;  %v287_v34 = vmul.f32 %v283_v33, %v283_v33  ;;  %v285_v40 = vand.u32 2147483647, %v283_v33 }
  0x32   : > { %v284_v35 = vsel %vm282_vm1, %v236_v6, 0.0 }
  0x33   : > { %v288_v36 = vmul.f32 %v284_v35, %v284_v35  ;;  %v286_v41 = vand.u32 2147483647, %v284_v35  ;;  %v413_v42 = vadd.f32 -1.0, %v285_v40 }
  0x35   : > { %v294_v38 = vadd.f32 %v288_v36, %v287_v34  ;;  %v414_v43 = vadd.f32 -1.0, %v286_v41  ;;  %v299_v44 = vadd.f32 %v286_v41, %v285_v40  ;;  %v291_v45 = vmax.f32 %v413_v42, 0.0 }
  0x36   : > { %v311_v54 = vmax.f32 %v285_v40, %v286_v41 }
  0x37   : > { %v295_v39 = vadd.f32 %v294_v38, %v293_v37  ;;  %v292_v46 = vmax.f32 %v414_v43, 0.0  ;;  %v300_v48 = vadd.f32 %v415_v47, %v299_v44  ;;  %v304_v49 = vmul.f32 %v291_v45, %v291_v45 }
  0x38   : > { %v312_v56 = vmax.f32 %v419_v55, %v311_v54 }
  0x39   : > { %296 = vst [vmem:[%s511_s20] sm:$0xff] %v295_v39  ;;  %416 = vst [vmem:[%s511_s20 + $0x8] sm:$0xff] %v300_v48  ;;  %v305_v50 = vmul.f32 %v292_v46, %v292_v46 }
  0x3a   : > { %420 = vst [vmem:[%s511_s20 + $0x18] sm:$0xff] %v312_v56 }
  0x3b   : > { %v306_v51 = vadd.f32 %v305_v50, %v304_v49 }
  0x3d   : > { %v307_v53 = vadd.f32 %v417_v52, %v306_v51 }
  0x3f   : > { %418 = vst [vmem:[%s511_s20 + $0x10] sm:$0xff] %v307_v53 }
  0x40 PF: > { %s12_s11 = sadd.s32 1, %s470_s11   ;;  %s554_s9 = smov %s466_s10 }
  0x41   : > { %p9_p9 = scmp.ge.s32.totalorder %s12_s11, 4   ;;  %s555_s10 = smov %s557_s12 }
  0x43   :  { %11 = sbr.rel (!%p9_p9) target bundleno = 2 (0x2), region = 79 }

</bundles_post_ra>
